<compile_context>
chip_gen: v7x
topology: tpu7x:2x2x1
jax: 0.10.0
libtpu: 0.0.40
codegen_flags: <defaults>
</compile_context>

<pallas_src>
import functools

import jax
import jax.numpy as jnp
from jax import lax
from jax.experimental import pallas as pl
from jax.experimental.pallas import tpu as pltpu


def _spatial_attention_kernel(x_ref, w1_ref, sb1_ref, wdc_ref, sbdc_ref,
                              wf_ref, bf_ref, out_ref,
                              flat_ref, stack_ref, *, H, W, Cmp, n_convs,
                              dilation, pad, nb):
    HW = H * W
    d = dilation
    stride = HW + 2 * pad                        # per-image slab in flat_ref

    # Column-validity masks for the +/-d horizontal taps, generated in-kernel
    # (depend only on W and d) -- saves one input DMA + BlockSpec.
    xcol = lax.broadcasted_iota(jnp.int32, (1, HW), 1) % W
    cm_neg = (xcol >= d).astype(jnp.float32)          # output col x: x - d >= 0
    cm_pos = (xcol < (W - d)).astype(jnp.float32)     # output col x: x + d <  W

    # Zero only the halo (row-padding) strips of every image slab, once per
    # grid step; interiors are fully rewritten before every conv.
    # NOTE: must run on EVERY step (grid axis is sharded across TensorCores).
    zpad = jnp.zeros((Cmp, pad), jnp.float32)
    for b in range(nb):
        flat_ref[:, b * stride:b * stride + pad] = zpad
        flat_ref[:, b * stride + pad + HW:(b + 1) * stride] = zpad

    w1 = w1_ref[...]                             # (Cmp, Cin)  bf16
    scale1 = sb1_ref[:, 0:1]                     # (Cmp, 1)    f32
    bias1 = sb1_ref[:, 1:2]
    wf = wf_ref[...]                             # (1, Cmp)    bf16
    bf = bf_ref[...]                             # (1, 1)      f32

    # ---- 1x1 reduce conv + folded BN + ReLU, per image (bf16 in, f32 acc);
    # results land directly in the f32 interiors of the row-padded flat buffer.
    # TODO(synk): for large images_per_step switch these static b-loops to
    # lax.fori_loop with pl.ds to bound code size / vreg live ranges.
    for b in range(nb):
        hb = jnp.dot(w1, x_ref[b], preferred_element_type=jnp.float32)
        flat_ref[:, b * stride + pad:b * stride + pad + HW] = (
            jnp.maximum(hb * scale1 + bias1, 0.0))

    # ---- dilated 3x3 convs: gather 9 shifted taps (bf16) and contract with a
    # single (Cmp, 9Cmp) @ (9Cmp, nb*HW) bf16 MXU matmul per conv (f32 acc).
    h = None                                     # (Cmp, nb*HW) f32 activations
    for i in range(n_convs):
        if i > 0:
            for b in range(nb):                  # write prev result back to flat
                flat_ref[:, b * stride + pad:b * stride + pad + HW] = (
                    h[:, b * HW:(b + 1) * HW])
        for ky in range(3):
            dy = (ky - 1) * d
            for kx in range(3):
                dx = (kx - 1) * d
                off = dy * W + dx
                t = ky * 3 + kx
                for b in range(nb):
                    base = b * stride + pad + off
                    s = flat_ref[:, base:base + HW]           # (Cmp, HW) f32
                    if dx < 0:
                        s = s * cm_neg           # zero reads that wrapped a row
                    elif dx > 0:
                        s = s * cm_pos
                    stack_ref[t * Cmp:(t + 1) * Cmp, b * HW:(b + 1) * HW] = (
                        s.astype(jnp.bfloat16))
        hh = jnp.dot(wdc_ref[i], stack_ref[...],              # bf16 x bf16
                     preferred_element_type=jnp.float32)      # (Cmp, nb*HW) f32
        sb = sbdc_ref[i]                                      # (Cmp, 2)
        h = jnp.maximum(hh * sb[:, 0:1] + sb[:, 1:2], 0.0)

    # ---- final 1x1 conv to a single channel; one lane-dense (1, nb*HW) store.
    out_ref[0] = (jnp.dot(wf, h.astype(jnp.bfloat16),
                          preferred_element_type=jnp.float32) + bf)


def _full_spec(arr):
    nd = arr.ndim
    return pl.BlockSpec(arr.shape, lambda i, _nd=nd: (0,) * _nd)


def _nbytes(a):
    return a.size * a.dtype.itemsize


def spatial_attention(x_nchw, params, *, n_convs=2, dilation=4,
                      images_per_step=1, expand=True):
    """Forward pass. With expand=True the output matches
    `self.attn(x).expand_as(x)` (NCHW, in x's dtype). Prefer expand=False to
    get the un-broadcast (N, 1, H, W) map and fuse the broadcast downstream
    (BAM multiplies it by x anyway) -- avoids a Cin-x HBM writeback."""
    N, Cin, H, W = x_nchw.shape
    HW = H * W
    d = dilation
    assert n_convs >= 1, "kernel assumes at least one dilated conv (BAM default 2)"
    Cmp = params['w1p'].shape[0]                      # padded mid channels (x8)
    # Halo width: covers max |dy*W + dx|, rounded to a lane-aligned 128 multiple.
    pad = ((d * W + d + 127) // 128) * 128
    stride = HW + 2 * pad

    nb = images_per_step
    assert N % nb == 0, (N, nb)
    grid = (N // nb,)

    # glue: NCHW -> (N, Cin, H*W) in bf16. Pure reshape (no HBM transpose);
    # halves HBM read bytes vs f32 and runs the 1x1 reduce at bf16 MXU rate.
    x_flat = x_nchw.reshape(N, Cin, HW).astype(jnp.bfloat16)

    kernel = functools.partial(_spatial_attention_kernel, H=H, W=W, Cmp=Cmp,
                               n_convs=n_convs, dilation=d, pad=pad, nb=nb)

    # Explicit VMEM budget: double-buffered x / out blocks + (double-buffered)
    # weights + the two scratch buffers, with generous headroom. 48 MiB cap is
    # safe on all generations (v7x physical VMEM is 64 MiB per TensorCore).
    est = (2 * nb * Cin * HW * 2                       # x block (bf16, 2 bufs)
           + 2 * nb * HW * 4                           # out block (f32, 2 bufs)
           + 2 * sum(_nbytes(params[k]) for k in
                     ('w1p', 'sb1p', 'wdcp', 'sbdcp', 'wfp', 'bf'))
           + Cmp * nb * stride * 4                     # flat scratch (f32)
           + 9 * Cmp * nb * HW * 2)                    # stacked taps (bf16)
    vmem_limit = int(min(max(4 * est, 4 << 20), 48 << 20))

    # NOTE: at real BAM sizes (Cin in the hundreds, larger H*W) the 1x1 reduce
    # should additionally be tiled over Cin with an extra "arbitrary" grid axis
    # and a VMEM f32 accumulator; at these demo shapes full blocks are tiny.
    attn = pl.pallas_call(
        kernel,
        out_shape=jax.ShapeDtypeStruct((N // nb, 1, nb * HW), jnp.float32),
        grid=grid,
        in_specs=[
            pl.BlockSpec((nb, Cin, HW), lambda i: (i, 0, 0)),
            _full_spec(params['w1p']),
            _full_spec(params['sb1p']),
            _full_spec(params['wdcp']),
            _full_spec(params['sbdcp']),
            _full_spec(params['wfp']),
            _full_spec(params['bf']),
        ],
        out_specs=pl.BlockSpec((1, 1, nb * HW), lambda i: (i, 0, 0)),
        scratch_shapes=[
            pltpu.VMEM((Cmp, nb * stride), jnp.float32),    # row-padded activations
            pltpu.VMEM((9 * Cmp, nb * HW), jnp.bfloat16),   # stacked 9-tap operand
        ],
        compiler_params=pltpu.CompilerParams(
            dimension_semantics=("parallel",),
            vmem_limit_bytes=vmem_limit),
    )(x_flat, params['w1p'], params['sb1p'], params['wdcp'], params['sbdcp'],
      params['wfp'], params['bf'])

    attn = attn.reshape(N, 1, H, W)
    if not expand:
        return attn
    # glue: expand_as(x) -- broadcast in x's dtype (never wider than the input).
    return jnp.broadcast_to(attn.astype(x_nchw.dtype), (N, Cin, H, W))


def make_params(key, in_channels, out_channels, n_convs=2, dilation=4, eps=1e-5):
    """Deterministic synthetic parameters; BN uses eval (running-stats)
    semantics, folded with the preceding conv bias into per-channel
    (scale, bias). Matmul weights are rounded to bf16 once: the kernel consumes
    the bf16 copies, the f32 reference consumes the same (bf16-rounded) values,
    so the only residual difference is f32 accumulation order."""
    del dilation
    Cin, Cm = in_channels, out_channels
    Cmp = ((Cm + 7) // 8) * 8
    pc = Cmp - Cm
    ks = jax.random.split(key, 14)

    def bn_fold(kg, kb, km, kv, conv_bias, c):
        gamma = 1.0 + 0.1 * jax.random.normal(kg, (c,), jnp.float32)
        beta = 0.1 * jax.random.normal(kb, (c,), jnp.float32)
        mean = 0.1 * jax.random.normal(km, (c,), jnp.float32)
        var = 1.0 + 0.1 * jnp.abs(jax.random.normal(kv, (c,), jnp.float32))
        scale = gamma / jnp.sqrt(var + eps)
        bias = (conv_bias - mean) * scale + beta
        return jnp.stack([scale, bias], axis=0)                 # (2, c)

    def bf16_round(a):
        return a.astype(jnp.bfloat16).astype(jnp.float32)

    w1 = bf16_round(0.2 * jax.random.normal(ks[0], (Cin, Cm), jnp.float32))
    b1 = 0.1 * jax.random.normal(ks[1], (Cm,), jnp.float32)
    sb1 = bn_fold(ks[2], ks[3], ks[4], ks[5], b1, Cm)

    wdc_hwio = bf16_round(
        0.2 * jax.random.normal(ks[6], (n_convs, 3, 3, Cm, Cm), jnp.float32))
    bdc = 0.1 * jax.random.normal(ks[7], (n_convs, Cm), jnp.float32)
    sbdc = jnp.stack(
        [bn_fold(jax.random.fold_in(ks[8], i), jax.random.fold_in(ks[9], i),
                 jax.random.fold_in(ks[10], i), jax.random.fold_in(ks[11], i),
                 bdc[i], Cm) for i in range(n_convs)], axis=0)  # (n_convs, 2, Cm)

    wf = bf16_round(0.2 * jax.random.normal(ks[12], (1, Cm), jnp.float32))
    bf = 0.1 * jax.random.normal(ks[13], (1, 1), jnp.float32)

    # ---- kernel-layout params: channels on sublanes, zero-padded Cm -> Cmp,
    # MXU operands in bf16 (accumulation stays f32 in the kernel).
    w1p = jnp.pad(w1.T, ((0, pc), (0, 0))).astype(jnp.bfloat16)  # (Cmp, Cin)
    sb1p = jnp.pad(sb1.T, ((0, pc), (0, 0)))                     # (Cmp, 2) f32
    wdc_p = jnp.pad(wdc_hwio,
                    ((0, 0), (0, 0), (0, 0), (0, pc), (0, pc)))  # (n,3,3,Cmp,Cmp)
    # (n, cout, ky, kx, cin) -> (n, Cmp, 9*Cmp); flat index = (ky*3+kx)*Cmp + cin
    wdcp = jnp.transpose(wdc_p, (0, 4, 1, 2, 3)).reshape(
        n_convs, Cmp, 9 * Cmp).astype(jnp.bfloat16)
    sbdcp = jnp.pad(jnp.transpose(sbdc, (0, 2, 1)),
                    ((0, 0), (0, pc), (0, 0)))                   # (n, Cmp, 2) f32
    wfp = jnp.pad(wf, ((0, 0), (0, pc))).astype(jnp.bfloat16)    # (1, Cmp)

    return dict(w1=w1, sb1=sb1, wdc_hwio=wdc_hwio, sbdc=sbdc, wf=wf, bf=bf,
                w1p=w1p, sb1p=sb1p, wdcp=wdcp, sbdcp=sbdcp, wfp=wfp)


def reference(x_nchw, params, *, n_convs=2, dilation=4):
    """Pure-JAX reference (lax.conv_general_dilated), mirroring the kernel's
    bf16 operand rounding (f32 accumulation) for a tight comparison."""
    hp = lax.Precision.HIGHEST
    x = jnp.transpose(x_nchw, (0, 2, 3, 1))
    x = x.astype(jnp.bfloat16).astype(jnp.float32)      # kernel feeds bf16 x
    h = jnp.einsum('nhwc,cd->nhwd', x, params['w1'], precision=hp)
    h = jnp.maximum(h * params['sb1'][0] + params['sb1'][1], 0.0)
    for i in range(n_convs):
        h = h.astype(jnp.bfloat16).astype(jnp.float32)  # kernel's bf16 tap stack
        h = lax.conv_general_dilated(
            h, params['wdc_hwio'][i], window_strides=(1, 1),
            padding=[(dilation, dilation)] * 2,
            rhs_dilation=(dilation, dilation),
            dimension_numbers=('NHWC', 'HWIO', 'NHWC'), precision=hp)
        h = jnp.maximum(h * params['sbdc'][i, 0] + params['sbdc'][i, 1], 0.0)
    h = h.astype(jnp.bfloat16).astype(jnp.float32)      # kernel's bf16 final 1x1
    attn = jnp.einsum('nhwc,c->nhw', h, params['wf'][0],
                      precision=hp) + params['bf'][0, 0]
    return jnp.broadcast_to(attn[:, None, :, :], x_nchw.shape)


if __name__ == "__main__":
    key = jax.random.PRNGKey(0)
    kx, kp = jax.random.split(key)

    N, Cin, H, W = 2, 8, 16, 16     # NCHW input, small shapes
    Cm = 4                          # reduced (mid) channels
    n_convs, dilation = 2, 4

    x = jax.random.normal(kx, (N, Cin, H, W), jnp.float32)
    params = make_params(kp, Cin, Cm, n_convs=n_convs, dilation=dilation)
    ref = reference(x, params, n_convs=n_convs, dilation=dilation)

    # images_per_step=1 keeps grid=(2,) "parallel" (both v7x TensorCores busy).
    out = spatial_attention(x, params, n_convs=n_convs, dilation=dilation,
                            images_per_step=1)
    out = jax.block_until_ready(out)
    assert out.shape == x.shape, (out.shape, x.shape)
    max_err = float(jnp.max(jnp.abs(out - ref)))
    assert jnp.allclose(out, ref, atol=1e-3, rtol=1e-3), max_err

    # Also exercise the lane-batched path (several images per grid step),
    # the recommended setting on single-TC v5e/v6e.
    out2 = spatial_attention(x, params, n_convs=n_convs, dilation=dilation,
                             images_per_step=2)
    out2 = jax.block_until_ready(out2)
    max_err2 = float(jnp.max(jnp.abs(out2 - ref)))
    assert jnp.allclose(out2, ref, atol=1e-3, rtol=1e-3), max_err2

    print("KERNEL_OK")
</pallas_src>

<mosaic_0001>
module attributes {stable_mosaic.version = 11 : i64} {
  func.func @_spatial_attention_kernel(%arg0: i32, %arg1: memref<1x8x256xbf16, #tpu.memory_space<vmem>>, %arg2: memref<8x8xbf16, #tpu.memory_space<vmem>>, %arg3: memref<8x2xf32, #tpu.memory_space<vmem>>, %arg4: memref<2x8x72xbf16, #tpu.memory_space<vmem>>, %arg5: memref<2x8x2xf32, #tpu.memory_space<vmem>>, %arg6: memref<1x8xbf16, #tpu.memory_space<vmem>>, %arg7: memref<1x1xf32, #tpu.memory_space<vmem>>, %arg8: memref<1x1x256xf32, #tpu.memory_space<vmem>>, %arg9: memref<8x512xf32, #tpu.memory_space<vmem>>, %arg10: memref<72x256xbf16, #tpu.memory_space<vmem>>) attributes {dimension_semantics = [#tpu.dimension_semantics<parallel>], iteration_bounds = array<i64: 2>, scalar_prefetch = 0 : i64, scratch_operands = 2 : i64, tpu.core_type = #tpu.core_type<tc>, window_params = [{transform_indices = @transform_0, window_bounds = array<i64: 1, 8, 256>}, {pipeline_mode = #tpu.pipeline_mode<synchronous>, transform_indices = @transform_1, window_bounds = array<i64: 8, 8>}, {pipeline_mode = #tpu.pipeline_mode<synchronous>, transform_indices = @transform_2, window_bounds = array<i64: 8, 2>}, {pipeline_mode = #tpu.pipeline_mode<synchronous>, transform_indices = @transform_3, window_bounds = array<i64: 2, 8, 72>}, {pipeline_mode = #tpu.pipeline_mode<synchronous>, transform_indices = @transform_4, window_bounds = array<i64: 2, 8, 2>}, {pipeline_mode = #tpu.pipeline_mode<synchronous>, transform_indices = @transform_5, window_bounds = array<i64: 1, 8>}, {pipeline_mode = #tpu.pipeline_mode<synchronous>, transform_indices = @transform_6, window_bounds = array<i64: 1, 1>}, {transform_indices = @transform_7, window_bounds = array<i64: 1, 1, 256>}]} {
    %0 = tpu.iota {dimensions = array<i32: 1>} : vector<1x256xi32>
    %c16_i32 = arith.constant 16 : i32
    %c0_i32 = arith.constant 0 : i32
    %1 = arith.cmpi eq, %c16_i32, %c0_i32 : i32
    %c1_i32 = arith.constant 1 : i32
    %2 = arith.select %1, %c1_i32, %c16_i32 : i32
    %3 = vector.broadcast %2 : i32 to vector<1x256xi32>
    %4 = arith.remsi %0, %3 : vector<1x256xi32>
    %c0_i32_0 = arith.constant 0 : i32
    %5 = vector.broadcast %c0_i32_0 : i32 to vector<1x256xi32>
    %6 = arith.cmpi ne, %4, %5 : vector<1x256xi32>
    %c0_i32_1 = arith.constant 0 : i32
    %7 = vector.broadcast %c0_i32_1 : i32 to vector<1x256xi32>
    %8 = arith.cmpi slt, %4, %7 : vector<1x256xi32>
    %c0_i32_2 = arith.constant 0 : i32
    %9 = arith.cmpi slt, %2, %c0_i32_2 : i32
    %10 = vector.broadcast %9 : i1 to vector<1x256xi1>
    %11 = vector.broadcast %10 : vector<1x256xi1> to vector<1x256xi1>
    %12 = arith.xori %8, %11 : vector<1x256xi1>
    %13 = arith.andi %12, %6 : vector<1x256xi1>
    %14 = vector.broadcast %2 : i32 to vector<1x256xi32>
    %15 = arith.addi %4, %14 : vector<1x256xi32>
    %16 = arith.select %13, %15, %4 : vector<1x256xi1>, vector<1x256xi32>
    %c4_i32 = arith.constant 4 : i32
    %17 = vector.broadcast %c4_i32 : i32 to vector<1x256xi32>
    %18 = arith.cmpi sge, %16, %17 : vector<1x256xi32>
    %19 = arith.extui %18 : vector<1x256xi1> to vector<1x256xi32>
    %20 = arith.sitofp %19 : vector<1x256xi32> to vector<1x256xf32>
    %c12_i32 = arith.constant 12 : i32
    %21 = vector.broadcast %c12_i32 : i32 to vector<1x256xi32>
    %22 = arith.cmpi slt, %16, %21 : vector<1x256xi32>
    %23 = arith.extui %22 : vector<1x256xi1> to vector<1x256xi32>
    %24 = arith.sitofp %23 : vector<1x256xi32> to vector<1x256xf32>
    %cst = arith.constant 0.000000e+00 : f32
    %25 = vector.broadcast %cst : f32 to vector<8x128xf32>
    %c0 = arith.constant 0 : index
    %c0_3 = arith.constant 0 : index
    %26 = vector.load %arg9[%c0, %c0_3] : memref<8x512xf32, #tpu.memory_space<vmem>>, vector<8x128xf32>
    tpu.vector_store %arg9[%c0, %c0_3], %25 {strides = array<i32>} : memref<8x512xf32, #tpu.memory_space<vmem>>, vector<8x128xf32>,
    %c0_4 = arith.constant 0 : index
    %c384 = arith.constant 384 : index
    %27 = vector.load %arg9[%c0_4, %c384] : memref<8x512xf32, #tpu.memory_space<vmem>>, vector<8x128xf32>
    tpu.vector_store %arg9[%c0_4, %c384], %25 {strides = array<i32>} : memref<8x512xf32, #tpu.memory_space<vmem>>, vector<8x128xf32>,
    %c0_5 = arith.constant 0 : index
    %c0_6 = arith.constant 0 : index
    %28 = vector.load %arg2[%c0_5, %c0_6] : memref<8x8xbf16, #tpu.memory_space<vmem>>, vector<8x8xbf16>
    %c0_7 = arith.constant 0 : index
    %c0_8 = arith.constant 0 : index
    %29 = vector.load %arg3[%c0_7, %c0_8] : memref<8x2xf32, #tpu.memory_space<vmem>>, vector<8x1xf32>
    %c0_9 = arith.constant 0 : index
    %c1 = arith.constant 1 : index
    %30 = vector.load %arg3[%c0_9, %c1] : memref<8x2xf32, #tpu.memory_space<vmem>>, vector<8x1xf32>
    %c0_10 = arith.constant 0 : index
    %c0_11 = arith.constant 0 : index
    %31 = vector.load %arg6[%c0_10, %c0_11] : memref<1x8xbf16, #tpu.memory_space<vmem>>, vector<1x8xbf16>
    %c0_12 = arith.constant 0 : index
    %c0_13 = arith.constant 0 : index
    %32 = vector.load %arg7[%c0_12, %c0_13] : memref<1x1xf32, #tpu.memory_space<vmem>>, vector<1x1xf32>
    %c0_14 = arith.constant 0 : index
    %c0_15 = arith.constant 0 : index
    %c0_16 = arith.constant 0 : index
    %33 = vector.load %arg1[%c0_14, %c0_15, %c0_16] : memref<1x8x256xbf16, #tpu.memory_space<vmem>>, vector<1x8x256xbf16>
    %34 = vector.shape_cast %33 : vector<1x8x256xbf16> to vector<8x256xbf16>
    %cst_17 = arith.constant dense<0.000000e+00> : vector<8x256xf32>
    %35 = tpu.matmul %28, %34, %cst_17 {dimension_numbers = #tpu.dot_dimension_numbers<[1], [0], [0], [1], [0, 0, 1, 1], [], []>} : vector<8x8xbf16>, vector<8x256xbf16>, vector<8x256xf32> -> vector<8x256xf32>
    %36 = vector.broadcast %29 : vector<8x1xf32> to vector<8x256xf32>
    %37 = arith.mulf %35, %36 : vector<8x256xf32>
    %38 = vector.broadcast %30 : vector<8x1xf32> to vector<8x256xf32>
    %39 = arith.addf %37, %38 : vector<8x256xf32>
    %cst_18 = arith.constant 0.000000e+00 : f32
    %40 = vector.broadcast %cst_18 : f32 to vector<8x256xf32>
    %41 = arith.maximumf %39, %40 : vector<8x256xf32>
    %c0_19 = arith.constant 0 : index
    %c128 = arith.constant 128 : index
    %42 = vector.load %arg9[%c0_19, %c128] : memref<8x512xf32, #tpu.memory_space<vmem>>, vector<8x256xf32>
    tpu.vector_store %arg9[%c0_19, %c128], %41 {strides = array<i32>} : memref<8x512xf32, #tpu.memory_space<vmem>>, vector<8x256xf32>,
    %c0_20 = arith.constant 0 : index
    %c60 = arith.constant 60 : index
    %43 = vector.load %arg9[%c0_20, %c60] : memref<8x512xf32, #tpu.memory_space<vmem>>, vector<8x256xf32>
    %44 = vector.broadcast %20 : vector<1x256xf32> to vector<8x256xf32>
    %45 = arith.mulf %43, %44 : vector<8x256xf32>
    %46 = arith.truncf %45 : vector<8x256xf32> to vector<8x256xbf16>
    %c0_21 = arith.constant 0 : index
    %c0_22 = arith.constant 0 : index
    %47 = vector.load %arg10[%c0_21, %c0_22] : memref<72x256xbf16, #tpu.memory_space<vmem>>, vector<8x256xbf16>
    tpu.vector_store %arg10[%c0_21, %c0_22], %46 {strides = array<i32>} : memref<72x256xbf16, #tpu.memory_space<vmem>>, vector<8x256xbf16>,
    %c0_23 = arith.constant 0 : index
    %c64 = arith.constant 64 : index
    %48 = vector.load %arg9[%c0_23, %c64] : memref<8x512xf32, #tpu.memory_space<vmem>>, vector<8x256xf32>
    %49 = arith.truncf %48 : vector<8x256xf32> to vector<8x256xbf16>
    %c8 = arith.constant 8 : index
    %c0_24 = arith.constant 0 : index
    %50 = vector.load %arg10[%c8, %c0_24] : memref<72x256xbf16, #tpu.memory_space<vmem>>, vector<8x256xbf16>
    tpu.vector_store %arg10[%c8, %c0_24], %49 {strides = array<i32>} : memref<72x256xbf16, #tpu.memory_space<vmem>>, vector<8x256xbf16>,
    %c0_25 = arith.constant 0 : index
    %c68 = arith.constant 68 : index
    %51 = vector.load %arg9[%c0_25, %c68] : memref<8x512xf32, #tpu.memory_space<vmem>>, vector<8x256xf32>
    %52 = vector.broadcast %24 : vector<1x256xf32> to vector<8x256xf32>
    %53 = arith.mulf %51, %52 : vector<8x256xf32>
    %54 = arith.truncf %53 : vector<8x256xf32> to vector<8x256xbf16>
    %c16 = arith.constant 16 : index
    %c0_26 = arith.constant 0 : index
    %55 = vector.load %arg10[%c16, %c0_26] : memref<72x256xbf16, #tpu.memory_space<vmem>>, vector<8x256xbf16>
    tpu.vector_store %arg10[%c16, %c0_26], %54 {strides = array<i32>} : memref<72x256xbf16, #tpu.memory_space<vmem>>, vector<8x256xbf16>,
    %c0_27 = arith.constant 0 : index
    %c124 = arith.constant 124 : index
    %56 = vector.load %arg9[%c0_27, %c124] : memref<8x512xf32, #tpu.memory_space<vmem>>, vector<8x256xf32>
    %57 = vector.broadcast %20 : vector<1x256xf32> to vector<8x256xf32>
    %58 = arith.mulf %56, %57 : vector<8x256xf32>
    %59 = arith.truncf %58 : vector<8x256xf32> to vector<8x256xbf16>
    %c24 = arith.constant 24 : index
    %c0_28 = arith.constant 0 : index
    %60 = vector.load %arg10[%c24, %c0_28] : memref<72x256xbf16, #tpu.memory_space<vmem>>, vector<8x256xbf16>
    tpu.vector_store %arg10[%c24, %c0_28], %59 {strides = array<i32>} : memref<72x256xbf16, #tpu.memory_space<vmem>>, vector<8x256xbf16>,
    %c0_29 = arith.constant 0 : index
    %c128_30 = arith.constant 128 : index
    %61 = vector.load %arg9[%c0_29, %c128_30] : memref<8x512xf32, #tpu.memory_space<vmem>>, vector<8x256xf32>
    %62 = arith.truncf %61 : vector<8x256xf32> to vector<8x256xbf16>
    %c32 = arith.constant 32 : index
    %c0_31 = arith.constant 0 : index
    %63 = vector.load %arg10[%c32, %c0_31] : memref<72x256xbf16, #tpu.memory_space<vmem>>, vector<8x256xbf16>
    tpu.vector_store %arg10[%c32, %c0_31], %62 {strides = array<i32>} : memref<72x256xbf16, #tpu.memory_space<vmem>>, vector<8x256xbf16>,
    %c0_32 = arith.constant 0 : index
    %c132 = arith.constant 132 : index
    %64 = vector.load %arg9[%c0_32, %c132] : memref<8x512xf32, #tpu.memory_space<vmem>>, vector<8x256xf32>
    %65 = vector.broadcast %24 : vector<1x256xf32> to vector<8x256xf32>
    %66 = arith.mulf %64, %65 : vector<8x256xf32>
    %67 = arith.truncf %66 : vector<8x256xf32> to vector<8x256xbf16>
    %c40 = arith.constant 40 : index
    %c0_33 = arith.constant 0 : index
    %68 = vector.load %arg10[%c40, %c0_33] : memref<72x256xbf16, #tpu.memory_space<vmem>>, vector<8x256xbf16>
    tpu.vector_store %arg10[%c40, %c0_33], %67 {strides = array<i32>} : memref<72x256xbf16, #tpu.memory_space<vmem>>, vector<8x256xbf16>,
    %c0_34 = arith.constant 0 : index
    %c188 = arith.constant 188 : index
    %69 = vector.load %arg9[%c0_34, %c188] : memref<8x512xf32, #tpu.memory_space<vmem>>, vector<8x256xf32>
    %70 = vector.broadcast %20 : vector<1x256xf32> to vector<8x256xf32>
    %71 = arith.mulf %69, %70 : vector<8x256xf32>
    %72 = arith.truncf %71 : vector<8x256xf32> to vector<8x256xbf16>
    %c48 = arith.constant 48 : index
    %c0_35 = arith.constant 0 : index
    %73 = vector.load %arg10[%c48, %c0_35] : memref<72x256xbf16, #tpu.memory_space<vmem>>, vector<8x256xbf16>
    tpu.vector_store %arg10[%c48, %c0_35], %72 {strides = array<i32>} : memref<72x256xbf16, #tpu.memory_space<vmem>>, vector<8x256xbf16>,
    %c0_36 = arith.constant 0 : index
    %c192 = arith.constant 192 : index
    %74 = vector.load %arg9[%c0_36, %c192] : memref<8x512xf32, #tpu.memory_space<vmem>>, vector<8x256xf32>
    %75 = arith.truncf %74 : vector<8x256xf32> to vector<8x256xbf16>
    %c56 = arith.constant 56 : index
    %c0_37 = arith.constant 0 : index
    %76 = vector.load %arg10[%c56, %c0_37] : memref<72x256xbf16, #tpu.memory_space<vmem>>, vector<8x256xbf16>
    tpu.vector_store %arg10[%c56, %c0_37], %75 {strides = array<i32>} : memref<72x256xbf16, #tpu.memory_space<vmem>>, vector<8x256xbf16>,
    %c0_38 = arith.constant 0 : index
    %c196 = arith.constant 196 : index
    %77 = vector.load %arg9[%c0_38, %c196] : memref<8x512xf32, #tpu.memory_space<vmem>>, vector<8x256xf32>
    %78 = vector.broadcast %24 : vector<1x256xf32> to vector<8x256xf32>
    %79 = arith.mulf %77, %78 : vector<8x256xf32>
    %80 = arith.truncf %79 : vector<8x256xf32> to vector<8x256xbf16>
    %c64_39 = arith.constant 64 : index
    %c0_40 = arith.constant 0 : index
    %81 = vector.load %arg10[%c64_39, %c0_40] : memref<72x256xbf16, #tpu.memory_space<vmem>>, vector<8x256xbf16>
    tpu.vector_store %arg10[%c64_39, %c0_40], %80 {strides = array<i32>} : memref<72x256xbf16, #tpu.memory_space<vmem>>, vector<8x256xbf16>,
    %c0_41 = arith.constant 0 : index
    %c0_42 = arith.constant 0 : index
    %c0_43 = arith.constant 0 : index
    %82 = vector.load %arg4[%c0_41, %c0_42, %c0_43] : memref<2x8x72xbf16, #tpu.memory_space<vmem>>, vector<1x8x72xbf16>
    %83 = vector.shape_cast %82 : vector<1x8x72xbf16> to vector<8x72xbf16>
    %c0_44 = arith.constant 0 : index
    %c0_45 = arith.constant 0 : index
    %84 = vector.load %arg10[%c0_44, %c0_45] : memref<72x256xbf16, #tpu.memory_space<vmem>>, vector<72x256xbf16>
    %cst_46 = arith.constant dense<0.000000e+00> : vector<8x256xf32>
    %85 = tpu.matmul %83, %84, %cst_46 {dimension_numbers = #tpu.dot_dimension_numbers<[1], [0], [0], [1], [0, 0, 1, 1], [], []>} : vector<8x72xbf16>, vector<72x256xbf16>, vector<8x256xf32> -> vector<8x256xf32>
    %c0_47 = arith.constant 0 : index
    %c0_48 = arith.constant 0 : index
    %c0_49 = arith.constant 0 : index
    %86 = vector.load %arg5[%c0_47, %c0_48, %c0_49] : memref<2x8x2xf32, #tpu.memory_space<vmem>>, vector<1x8x2xf32>
    %87 = vector.shape_cast %86 : vector<1x8x2xf32> to vector<8x2xf32>
    %88 = vector.extract_strided_slice %87 {offsets = [0, 0], sizes = [8, 1], strides = [1, 1]} : vector<8x2xf32> to vector<8x1xf32>
    %89 = vector.broadcast %88 : vector<8x1xf32> to vector<8x256xf32>
    %90 = arith.mulf %85, %89 : vector<8x256xf32>
    %91 = vector.extract_strided_slice %87 {offsets = [0, 1], sizes = [8, 1], strides = [1, 1]} : vector<8x2xf32> to vector<8x1xf32>
    %92 = vector.broadcast %91 : vector<8x1xf32> to vector<8x256xf32>
    %93 = arith.addf %90, %92 : vector<8x256xf32>
    %cst_50 = arith.constant 0.000000e+00 : f32
    %94 = vector.broadcast %cst_50 : f32 to vector<8x256xf32>
    %95 = arith.maximumf %93, %94 : vector<8x256xf32>
    %c0_51 = arith.constant 0 : index
    %c128_52 = arith.constant 128 : index
    %96 = vector.load %arg9[%c0_51, %c128_52] : memref<8x512xf32, #tpu.memory_space<vmem>>, vector<8x256xf32>
    tpu.vector_store %arg9[%c0_51, %c128_52], %95 {strides = array<i32>} : memref<8x512xf32, #tpu.memory_space<vmem>>, vector<8x256xf32>,
    %c0_53 = arith.constant 0 : index
    %c60_54 = arith.constant 60 : index
    %97 = vector.load %arg9[%c0_53, %c60_54] : memref<8x512xf32, #tpu.memory_space<vmem>>, vector<8x256xf32>
    %98 = vector.broadcast %20 : vector<1x256xf32> to vector<8x256xf32>
    %99 = arith.mulf %97, %98 : vector<8x256xf32>
    %100 = arith.truncf %99 : vector<8x256xf32> to vector<8x256xbf16>
    %c0_55 = arith.constant 0 : index
    %c0_56 = arith.constant 0 : index
    %101 = vector.load %arg10[%c0_55, %c0_56] : memref<72x256xbf16, #tpu.memory_space<vmem>>, vector<8x256xbf16>
    tpu.vector_store %arg10[%c0_55, %c0_56], %100 {strides = array<i32>} : memref<72x256xbf16, #tpu.memory_space<vmem>>, vector<8x256xbf16>,
    %c0_57 = arith.constant 0 : index
    %c64_58 = arith.constant 64 : index
    %102 = vector.load %arg9[%c0_57, %c64_58] : memref<8x512xf32, #tpu.memory_space<vmem>>, vector<8x256xf32>
    %103 = arith.truncf %102 : vector<8x256xf32> to vector<8x256xbf16>
    %c8_59 = arith.constant 8 : index
    %c0_60 = arith.constant 0 : index
    %104 = vector.load %arg10[%c8_59, %c0_60] : memref<72x256xbf16, #tpu.memory_space<vmem>>, vector<8x256xbf16>
    tpu.vector_store %arg10[%c8_59, %c0_60], %103 {strides = array<i32>} : memref<72x256xbf16, #tpu.memory_space<vmem>>, vector<8x256xbf16>,
    %c0_61 = arith.constant 0 : index
    %c68_62 = arith.constant 68 : index
    %105 = vector.load %arg9[%c0_61, %c68_62] : memref<8x512xf32, #tpu.memory_space<vmem>>, vector<8x256xf32>
    %106 = vector.broadcast %24 : vector<1x256xf32> to vector<8x256xf32>
    %107 = arith.mulf %105, %106 : vector<8x256xf32>
    %108 = arith.truncf %107 : vector<8x256xf32> to vector<8x256xbf16>
    %c16_63 = arith.constant 16 : index
    %c0_64 = arith.constant 0 : index
    %109 = vector.load %arg10[%c16_63, %c0_64] : memref<72x256xbf16, #tpu.memory_space<vmem>>, vector<8x256xbf16>
    tpu.vector_store %arg10[%c16_63, %c0_64], %108 {strides = array<i32>} : memref<72x256xbf16, #tpu.memory_space<vmem>>, vector<8x256xbf16>,
    %c0_65 = arith.constant 0 : index
    %c124_66 = arith.constant 124 : index
    %110 = vector.load %arg9[%c0_65, %c124_66] : memref<8x512xf32, #tpu.memory_space<vmem>>, vector<8x256xf32>
    %111 = vector.broadcast %20 : vector<1x256xf32> to vector<8x256xf32>
    %112 = arith.mulf %110, %111 : vector<8x256xf32>
    %113 = arith.truncf %112 : vector<8x256xf32> to vector<8x256xbf16>
    %c24_67 = arith.constant 24 : index
    %c0_68 = arith.constant 0 : index
    %114 = vector.load %arg10[%c24_67, %c0_68] : memref<72x256xbf16, #tpu.memory_space<vmem>>, vector<8x256xbf16>
    tpu.vector_store %arg10[%c24_67, %c0_68], %113 {strides = array<i32>} : memref<72x256xbf16, #tpu.memory_space<vmem>>, vector<8x256xbf16>,
    %c0_69 = arith.constant 0 : index
    %c128_70 = arith.constant 128 : index
    %115 = vector.load %arg9[%c0_69, %c128_70] : memref<8x512xf32, #tpu.memory_space<vmem>>, vector<8x256xf32>
    %116 = arith.truncf %115 : vector<8x256xf32> to vector<8x256xbf16>
    %c32_71 = arith.constant 32 : index
    %c0_72 = arith.constant 0 : index
    %117 = vector.load %arg10[%c32_71, %c0_72] : memref<72x256xbf16, #tpu.memory_space<vmem>>, vector<8x256xbf16>
    tpu.vector_store %arg10[%c32_71, %c0_72], %116 {strides = array<i32>} : memref<72x256xbf16, #tpu.memory_space<vmem>>, vector<8x256xbf16>,
    %c0_73 = arith.constant 0 : index
    %c132_74 = arith.constant 132 : index
    %118 = vector.load %arg9[%c0_73, %c132_74] : memref<8x512xf32, #tpu.memory_space<vmem>>, vector<8x256xf32>
    %119 = vector.broadcast %24 : vector<1x256xf32> to vector<8x256xf32>
    %120 = arith.mulf %118, %119 : vector<8x256xf32>
    %121 = arith.truncf %120 : vector<8x256xf32> to vector<8x256xbf16>
    %c40_75 = arith.constant 40 : index
    %c0_76 = arith.constant 0 : index
    %122 = vector.load %arg10[%c40_75, %c0_76] : memref<72x256xbf16, #tpu.memory_space<vmem>>, vector<8x256xbf16>
    tpu.vector_store %arg10[%c40_75, %c0_76], %121 {strides = array<i32>} : memref<72x256xbf16, #tpu.memory_space<vmem>>, vector<8x256xbf16>,
    %c0_77 = arith.constant 0 : index
    %c188_78 = arith.constant 188 : index
    %123 = vector.load %arg9[%c0_77, %c188_78] : memref<8x512xf32, #tpu.memory_space<vmem>>, vector<8x256xf32>
    %124 = vector.broadcast %20 : vector<1x256xf32> to vector<8x256xf32>
    %125 = arith.mulf %123, %124 : vector<8x256xf32>
    %126 = arith.truncf %125 : vector<8x256xf32> to vector<8x256xbf16>
    %c48_79 = arith.constant 48 : index
    %c0_80 = arith.constant 0 : index
    %127 = vector.load %arg10[%c48_79, %c0_80] : memref<72x256xbf16, #tpu.memory_space<vmem>>, vector<8x256xbf16>
    tpu.vector_store %arg10[%c48_79, %c0_80], %126 {strides = array<i32>} : memref<72x256xbf16, #tpu.memory_space<vmem>>, vector<8x256xbf16>,
    %c0_81 = arith.constant 0 : index
    %c192_82 = arith.constant 192 : index
    %128 = vector.load %arg9[%c0_81, %c192_82] : memref<8x512xf32, #tpu.memory_space<vmem>>, vector<8x256xf32>
    %129 = arith.truncf %128 : vector<8x256xf32> to vector<8x256xbf16>
    %c56_83 = arith.constant 56 : index
    %c0_84 = arith.constant 0 : index
    %130 = vector.load %arg10[%c56_83, %c0_84] : memref<72x256xbf16, #tpu.memory_space<vmem>>, vector<8x256xbf16>
    tpu.vector_store %arg10[%c56_83, %c0_84], %129 {strides = array<i32>} : memref<72x256xbf16, #tpu.memory_space<vmem>>, vector<8x256xbf16>,
    %c0_85 = arith.constant 0 : index
    %c196_86 = arith.constant 196 : index
    %131 = vector.load %arg9[%c0_85, %c196_86] : memref<8x512xf32, #tpu.memory_space<vmem>>, vector<8x256xf32>
    %132 = vector.broadcast %24 : vector<1x256xf32> to vector<8x256xf32>
    %133 = arith.mulf %131, %132 : vector<8x256xf32>
    %134 = arith.truncf %133 : vector<8x256xf32> to vector<8x256xbf16>
    %c64_87 = arith.constant 64 : index
    %c0_88 = arith.constant 0 : index
    %135 = vector.load %arg10[%c64_87, %c0_88] : memref<72x256xbf16, #tpu.memory_space<vmem>>, vector<8x256xbf16>
    tpu.vector_store %arg10[%c64_87, %c0_88], %134 {strides = array<i32>} : memref<72x256xbf16, #tpu.memory_space<vmem>>, vector<8x256xbf16>,
    %c1_89 = arith.constant 1 : index
    %c0_90 = arith.constant 0 : index
    %c0_91 = arith.constant 0 : index
    %136 = vector.load %arg4[%c1_89, %c0_90, %c0_91] : memref<2x8x72xbf16, #tpu.memory_space<vmem>>, vector<1x8x72xbf16>
    %137 = vector.shape_cast %136 : vector<1x8x72xbf16> to vector<8x72xbf16>
    %c0_92 = arith.constant 0 : index
    %c0_93 = arith.constant 0 : index
    %138 = vector.load %arg10[%c0_92, %c0_93] : memref<72x256xbf16, #tpu.memory_space<vmem>>, vector<72x256xbf16>
    %cst_94 = arith.constant dense<0.000000e+00> : vector<8x256xf32>
    %139 = tpu.matmul %137, %138, %cst_94 {dimension_numbers = #tpu.dot_dimension_numbers<[1], [0], [0], [1], [0, 0, 1, 1], [], []>} : vector<8x72xbf16>, vector<72x256xbf16>, vector<8x256xf32> -> vector<8x256xf32>
    %c1_95 = arith.constant 1 : index
    %c0_96 = arith.constant 0 : index
    %c0_97 = arith.constant 0 : index
    %140 = vector.load %arg5[%c1_95, %c0_96, %c0_97] : memref<2x8x2xf32, #tpu.memory_space<vmem>>, vector<1x8x2xf32>
    %141 = vector.shape_cast %140 : vector<1x8x2xf32> to vector<8x2xf32>
    %142 = vector.extract_strided_slice %141 {offsets = [0, 0], sizes = [8, 1], strides = [1, 1]} : vector<8x2xf32> to vector<8x1xf32>
    %143 = vector.broadcast %142 : vector<8x1xf32> to vector<8x256xf32>
    %144 = arith.mulf %139, %143 : vector<8x256xf32>
    %145 = vector.extract_strided_slice %141 {offsets = [0, 1], sizes = [8, 1], strides = [1, 1]} : vector<8x2xf32> to vector<8x1xf32>
    %146 = vector.broadcast %145 : vector<8x1xf32> to vector<8x256xf32>
    %147 = arith.addf %144, %146 : vector<8x256xf32>
    %cst_98 = arith.constant 0.000000e+00 : f32
    %148 = vector.broadcast %cst_98 : f32 to vector<8x256xf32>
    %149 = arith.maximumf %147, %148 : vector<8x256xf32>
    %150 = arith.truncf %149 : vector<8x256xf32> to vector<8x256xbf16>
    %cst_99 = arith.constant dense<0.000000e+00> : vector<1x256xf32>
    %151 = tpu.matmul %31, %150, %cst_99 {dimension_numbers = #tpu.dot_dimension_numbers<[1], [0], [0], [1], [0, 0, 1, 1], [], []>} : vector<1x8xbf16>, vector<8x256xbf16>, vector<1x256xf32> -> vector<1x256xf32>
    %152 = vector.broadcast %32 : vector<1x1xf32> to vector<1x256xf32>
    %153 = arith.addf %151, %152 : vector<1x256xf32>
    %c0_100 = arith.constant 0 : index
    %c0_101 = arith.constant 0 : index
    %c0_102 = arith.constant 0 : index
    %154 = vector.load %arg8[%c0_100, %c0_101, %c0_102] : memref<1x1x256xf32, #tpu.memory_space<vmem>>, vector<1x1x256xf32>
    %155 = vector.shape_cast %154 : vector<1x1x256xf32> to vector<1x256xf32>
    %156 = vector.shape_cast %153 : vector<1x256xf32> to vector<1x1x256xf32>
    tpu.vector_store %arg8[%c0_100, %c0_101, %c0_102], %156 {strides = array<i32>} : memref<1x1x256xf32, #tpu.memory_space<vmem>>, vector<1x1x256xf32>,
    return
  }
  func.func @transform_0(%arg0: i32) -> (i32, i32, i32) {
    %c0_i32 = arith.constant 0 : i32
    %c0_i32_0 = arith.constant 0 : i32
    %c0_i32_1 = arith.constant 0 : i32
    return %arg0, %c0_i32, %c0_i32_0 : i32, i32, i32
  }
  func.func @transform_1(%arg0: i32) -> (i32, i32) {
    %c0_i32 = arith.constant 0 : i32
    %c0_i32_0 = arith.constant 0 : i32
    %c0_i32_1 = arith.constant 0 : i32
    return %c0_i32, %c0_i32_0 : i32, i32
  }
  func.func @transform_2(%arg0: i32) -> (i32, i32) {
    %c0_i32 = arith.constant 0 : i32
    %c0_i32_0 = arith.constant 0 : i32
    %c0_i32_1 = arith.constant 0 : i32
    return %c0_i32, %c0_i32_0 : i32, i32
  }
  func.func @transform_3(%arg0: i32) -> (i32, i32, i32) {
    %c0_i32 = arith.constant 0 : i32
    %c0_i32_0 = arith.constant 0 : i32
    %c0_i32_1 = arith.constant 0 : i32
    %c0_i32_2 = arith.constant 0 : i32
    return %c0_i32, %c0_i32_0, %c0_i32_1 : i32, i32, i32
  }
  func.func @transform_4(%arg0: i32) -> (i32, i32, i32) {
    %c0_i32 = arith.constant 0 : i32
    %c0_i32_0 = arith.constant 0 : i32
    %c0_i32_1 = arith.constant 0 : i32
    %c0_i32_2 = arith.constant 0 : i32
    return %c0_i32, %c0_i32_0, %c0_i32_1 : i32, i32, i32
  }
  func.func @transform_5(%arg0: i32) -> (i32, i32) {
    %c0_i32 = arith.constant 0 : i32
    %c0_i32_0 = arith.constant 0 : i32
    %c0_i32_1 = arith.constant 0 : i32
    return %c0_i32, %c0_i32_0 : i32, i32
  }
  func.func @transform_6(%arg0: i32) -> (i32, i32) {
    %c0_i32 = arith.constant 0 : i32
    %c0_i32_0 = arith.constant 0 : i32
    %c0_i32_1 = arith.constant 0 : i32
    return %c0_i32, %c0_i32_0 : i32, i32
  }
  func.func @transform_7(%arg0: i32) -> (i32, i32, i32) {
    %c0_i32 = arith.constant 0 : i32
    %c0_i32_0 = arith.constant 0 : i32
    %c0_i32_1 = arith.constant 0 : i32
    return %arg0, %c0_i32, %c0_i32_0 : i32, i32, i32
  }
}

</mosaic_0001>

<bundles_post_ra>
// kernel: tpu_custom_call.1
= control target key start
LH: loop header
LB: loop body
LE: loop exit
PB: predicated region body
PF: predicated region fallthrough
CT: control target
= control target key end

     0   :  { %s1915_s0 = inlined_call_operand.vmem [shape: bf16[2,8,256], index: 0, kind: input, shape index: {}]   ;;  %s1916_s1 = inlined_call_operand.vmem [shape: bf16[8,8], index: 1, kind: input, shape index: {}]   ;;  %s1917_s2 = inlined_call_operand.vmem [shape: f32[8,2], index: 2, kind: input, shape index: {}]   ;;  %s1918_s3 = inlined_call_operand.vmem [shape: bf16[2,8,72], index: 3, kind: input, shape index: {}]   ;;  %s1919_s4 = inlined_call_operand.vmem [shape: f32[2,8,2], index: 4, kind: input, shape index: {}]   ;;  %s1920_s5 = inlined_call_operand.vmem [shape: bf16[1,8], index: 5, kind: input, shape index: {}]   ;;  %s1921_s6 = inlined_call_operand.<no memory space> [shape: f32[1,1], index: 6, kind: input, shape index: {}]   ;;  %s1922_s7 = inlined_call_operand.hbm [shape: f32[2,1,256], index: 7, kind: output, shape index: {}]  }
   0x1   :  { %v12_v0 = vstv %s1921_s6 }
   0x2   :  { %13 = vst [vmem:[#allocation4] sm:$0x1] %v12_v0 }
   0x3   :  { %14 = vsyncpa [#allocation6], 0 }
   0x4   :  { %16 = vsyncpa [#allocation6 + $0x1], 0  ;;  %s1604_s26 = smov 0   ;;  %s1606_s27 = smov 0  }
   0x5   :  { %s1608_s28 = smov 0   ;;  %s1610_s29 = smov 0  }
   0x6 LB: > { %s1625_s6 = sadd.s32 4294967295, %s1548_s29   ;;  %s1293_s30 = sadd.s32 4294967294, %s1548_s29   ;;  %s1548_s29 = sphi %s1610_s29, %s1928_s29   ;;  %s1544_s28 = sphi %s1608_s28, %s1927_s28   ;;  %s1540_s27 = sphi %s1606_s27, %s1926_s27   ;;  %s1536_s26 = sphi %s1604_s26, %s1925_s26  }
   0x7   : > { %s1629_s8 = sadd.s32 1, %s1548_s29   ;;  %s181_s9 = sadd.s32 1, %s1544_s28 }
   0x8   : > { %s178_s10 = ssub.s32 %s1548_s29, %s1629_s8  ;;  %p191_p0 = scmp.ne.s32.totalorder %s1544_s28, %s1540_s27 }
   0x9   : > { %p179_p1 = scmp.eq.s32.totalorder %s178_s10, 0  ;;  %p192_p2 = scmp.eq.s32.totalorder %s1625_s6, 1 }
   0xa   : > { %p197_p3 = scmp.ne.s32.totalorder %s1540_s27, %s1536_s26  ;;  %p198_p4 = scmp.eq.s32.totalorder %s1293_s30, 1 }
   0xb   : > { %s1640_s11 = scalar_select %p179_p1, %s1544_s28, %s181_s9  }
   0xc   : > { %p1642_p5 = por %p192_p2, %p191_p0  ;;  %p1646_p6 = por %p198_p4, %p197_p3 }
   0xd   : > { %p1296_p7 = scmp.ge.s32.totalorder %s1548_s29, 1  ;;  %p242_p8 = scmp.lt.s32.totalorder %s1548_s29, 3 }
   0xf   : > { %p243_p9 = pnand %p1296_p7, %p242_p8 }
  0x10   : > { %p274_p10 = scmp.lt.s32.totalorder (!%p243_p9), %s1625_s6, 1  ;;  %v280_v1 = vlaneseq (!%p243_p9)  ;;  %v1550_v2 = vmov (!%p243_p9), 0   ;;  %v322_v3 = vld [vmem:[%s1917_s2] sm:$0xff] (!%p243_p9)  ;;  %vm335_vm0 = vcmask (!%p243_p9), 1043456   ;;  %v1551_v8 = vmov (!%p243_p9), 1   ;;  %s1553_s23 = smov (!%p243_p9), 60  }
  0x11   : > { %246 = sbr.rel (%p243_p9) target bundleno = 1241 (0x4d9), region = 48  ;;  %374 = vmatprep.mubr.bf16.mxu0 (!%p243_p9), %v1550_v2  ;;  %1460 = vset.pattern.permute.xlu0 (!%p243_p9), %v1550_v2  ;;  %v1552_v12 = vmov (!%p243_p9), 0.0   ;;  %v321_v18 = vld [vmem:[%s1916_s1] sm:$0xf] (!%p243_p9)  ;;  %vm331_vm5 = vcmask (!%p243_p9), 64512   ;;  %s1554_s24 = smov (!%p243_p9), 4  }
  0x12   : > { %385 = vperm.xlu0 (!%p243_p9), %1460, %v322_v3   ;;  %v281_v4 = vand.u32 (!%p243_p9), 127, %v280_v1  ;;  %764 = vmatprep.mubr.bf16.mxu1 (!%p243_p9), %v1550_v2  ;;  %s1555_s25 = smov (!%p243_p9), 68   ;;  %s1556_s30 = smov (!%p243_p9), 124   ;;  %vm409_vm6 = vcmask (!%p243_p9), 490496   ;;  %vm436_vm7 = vcmask (!%p243_p9), 556032   ;;  %vm537_vm8 = vcmask (!%p243_p9), 31744  }
  0x13   : > { %1482 = vset.pattern.permute.xlu1 (!%p243_p9), %v1550_v2  ;;  %vm511_vm9 = vcmask (!%p243_p9), 1014784   ;;  %s1557_s9 = smov (!%p243_p9), 64   ;;  %vm461_vm10 = vcmask (!%p243_p9), 523264   ;;  %vm722_vm11 = vcmask (!%p243_p9), 588800   ;;  %vm1216_vm12 = vcmp.lt.s32.totalorder (!%p243_p9), %v280_v1, 256 }
  0x14   : > { %v282_v5 = vadd.s32 (!%p243_p9), 128, %v281_v4  ;;  %v287_v6 = vand.u32 (!%p243_p9), 15, %v281_v4 }
  0x16   : > { %1461 = vset.pattern.permute.xlu0 (!%p243_p9), %v1551_v8  ;;  %v294_v9 = vand.u32 (!%p243_p9), 15, %v282_v5  ;;  %vm307_vm1 = vcmp.ge.s32.totalorder (!%p243_p9), %v287_v6, 4  ;;  %vm313_vm2 = vcmp.lt.s32.totalorder (!%p243_p9), %v287_v6, 12 }
  0x17   : > { %391 = vperm.xlu0 (!%p243_p9), %1461, %v322_v3   ;;  %v1300_v13 = vsel (!%p243_p9), %vm307_vm1, 1.0, %v1552_v12  ;;  %v1302_v14 = vsel (!%p243_p9), %vm313_vm2, 1.0, %v1552_v12 }
  0x18   : > { %s275_s16 = scalar_select %p274_p10, %s1625_s6, 1  ;;  %vm308_vm3 = vcmp.ge.s32.totalorder %v294_v9, 4  ;;  %vm314_vm4 = vcmp.lt.s32.totalorder %v294_v9, 12 }
  0x19   : > { %v1301_v16 = vsel %vm308_vm3, 1.0, %v1552_v12  ;;  %v1303_v17 = vsel %vm314_vm4, 1.0, %v1552_v12 }
  0x1a   : > { %s1375_s17 = sshll.u32 %s275_s16, 3  ;;  %v1462_v19 = vpack.i.bf16 %v1301_v16, %v1300_v13  ;;  %v1477_v20 = vpack.i.bf16 %v1303_v17, %v1302_v14 }
  0x1b   : > { %s278_s20 = scalar_lea.vmem %s1915_s0, %s1375_s17 }
  0x1c   : > { %v325_v7 = vld [vmem:[%s278_s20] sm:$0xff]  ;;  %1463 = vrot.lane.b32.xlu1 %v1462_v19, %s1553_s23  ;;  %1478 = vrot.lane.b32.xlu0 %v1477_v20, %s1554_s24 }
  0x1d   : > { %v1305_v10 = vcombine.high %v325_v7, %v325_v7  ;;  %v1304_v11 = vcombine.low %v325_v7, %v325_v7 }
  0x1f   : > { %1306 = vmatprep.subr.msk.bf16.mxu0 %vm335_vm0, %v1305_v10  ;;  %v337_v15 = vsel %vm335_vm0, %v1304_v11, 0 }
  0x20   : > { %343 = vmatpush1.bf16.msra.mxu0 %v337_v15  ;;  %1468 = vrot.lane.b32.xlu1 %v1477_v20, %s1555_s25  ;;  %v1558_v20 = vmov 0.0|0.0  }
  0x23   : > { %1307 = vmatmul.mubr.msk.bf16.vlgmr.msra.gmra.mrb[0].mxu0 %vm331_vm5, %v321_v18 }
  0x24   : > { %1109 = vmatprep.mubr.bf16.mxu0 %v1550_v2  ;;  %1473 = vrot.lane.b32.xlu1 %v1462_v19, %s1556_s30 }
  0x8e   : > { %v1464_v27 = vpop.permute.xlu1 %1463 }
  0x8f   : > { %v1684_v29 = vunpack.i.h.bf16 %v1464_v27  ;;  %v1686_v30 = vunpack.i.l.bf16 %v1464_v27 }
  0x91   : > { %v386_v21 = vpop.permute.xlu0 %385  ;;  %v1695_v40 = vsel %vm409_vm6, %v1686_v30, %v1684_v29  ;;  %v1700_v46 = vmul.f32 0.0, %v1686_v30  ;;  %v594_v17 = vmul.f32 0.0, %v1684_v29 }
  0x92   : > { %v1469_v28 = vpop.permute.xlu1 %1468 }
  0x93   : > { %v1688_v36 = vunpack.i.h.bf16 %v1469_v28  ;;  %v1690_v37 = vunpack.i.l.bf16 %v1469_v28  ;;  %v1749_v18 = vpack.c.bf16 %v594_v17, %v594_v17 }
  0x95   : > { %v1705_v47 = vsel %vm436_vm7, %v1690_v37, %v1688_v36  ;;  %v1714_v54 = vmul.f32 0.0, %v1690_v37  ;;  %v645_v19 = vmul.f32 0.0, %v1688_v36 }
  0x96   : > { %v392_v22 = vpop.permute.xlu0 %391  ;;  %v1474_v43 = vpop.permute.xlu1 %1473 }
  0x97   : > { %v1709_v50 = vunpack.i.h.bf16 %v1474_v43  ;;  %v1475_v51 = vunpack.i.l.bf16 %v1474_v43 }
  0x99   : > { %v1732_v0 = vsel %vm511_vm9, %v1475_v51, %v1709_v50  ;;  %v1738_v9 = vmul.f32 0.0, %v1475_v51 }
  0x9a   : > { %v1479_v23 = vpop.permute.xlu0 %1478 }
  0x9b   : > { %v1481_v24 = vunpack.i.h.bf16 %v1479_v23  ;;  %v1697_v44 = vunpack.i.l.bf16 %v1479_v23 }
  0x9d   : > { %v566_v25 = vmul.f32 0.0, %v1481_v24  ;;  %v1720_v56 = vsel %vm537_vm8, %v1697_v44, %v1481_v24 }
  0x9f   : > { %v1680_v26 = vpack.c.bf16 %v566_v25, %v566_v25 }
  0xa1   : > { %580 = vrot.lane.b32.xlu0 %v1680_v26, %s1556_s30 }
  0xf6   : > { %v376_v31 = vpop.f32.mrb[0].mxu0 }
  0xf7   : > { %v388_v32 = vmul.f32 %v386_v21, %v376_v31  ;;  %v378_v33 = vpop.f32.mrb[1].mxu0 }
  0xf8   : > { %v389_v34 = vmul.f32 %v386_v21, %v378_v33  ;;  %v380_v35 = vpop.f32.mrb[2].mxu0  ;;  %v1759_v21 = vpack.c.bf16 %v645_v19, %v645_v19 }
  0xf9   : > { %v394_v38 = vadd.f32 %v392_v22, %v388_v32  ;;  %v381_v39 = vpop.f32.mrb[3].mxu0 }
  0xfa   : > { %v395_v41 = vadd.f32 %v392_v22, %v389_v34  ;;  %v773_v22 = vld [vmem:[%s1919_s4] sm:$0xff] }
  0xfb   : > { %v396_v42 = vmax.f32 %v394_v38, 0.0 }
  0xfc   : > { %v397_v45 = vmax.f32 %v395_v41, 0.0 }
  0xfd   : > { %v1378_v48 = vpack.c.bf16 %v396_v42, %v1552_v12  ;;  %v415_v49 = vmul.f32 %v1695_v40, %v396_v42  ;;  %v480_v58 = vmul.f32 %v1705_v47, %v396_v42  ;;  %v564_v59 = vmul.f32 %v1697_v44, %v396_v42 }
  0xfe   : > { %v1379_v52 = vpack.c.bf16 %v397_v45, %v397_v45  ;;  %v416_v53 = vmul.f32 %v1684_v29, %v397_v45  ;;  %v1716_v55 = vpack.c.bf16 %v397_v45, %v396_v42  ;;  %v565_v60 = vmul.f32 %v1720_v56, %v397_v45 }
  0xff   : > { %454 = vrot.lane.b32.xlu1 %v1378_v48, %s1557_s9  ;;  %v1376_v57 = vpack.c.bf16 %v415_v49, %v1700_v46  ;;  %v592_v61 = vmul.f32 %v1686_v30, %v396_v42  ;;  %v593_v62 = vmul.f32 %v1695_v40, %v397_v45  ;;  %v643_v63 = vmul.f32 %v1690_v37, %v396_v42 }
 0x100   : > { %456 = vrot.lane.b32.xlu0 %v1379_v52, %s1557_s9  ;;  %v1377_v3 = vpack.c.bf16 %v416_v53, %v416_v53  ;;  %v481_v4 = vmul.f32 %v1688_v36, %v397_v45  ;;  %v644_v5 = vmul.f32 %v1705_v47, %v397_v45  ;;  %v1385_v6 = vpack.c.bf16 %v565_v60, %v564_v59 }
 0x101   : > { %v1387_v7 = vpack.c.bf16 %v593_v62, %v592_v61  ;;  %v1380_v10 = vpack.c.bf16 %v480_v58, %v1714_v54  ;;  %v517_v11 = vmul.f32 %v1732_v0, %v396_v42  ;;  %v518_v14 = vmul.f32 %v1709_v50, %v397_v45 }
 0x102   : > { %v1391_v8 = vpack.c.bf16 %v644_v5, %v643_v63  ;;  %v1381_v13 = vpack.c.bf16 %v481_v4, %v481_v4 }
 0x103   : > { %428 = vrot.lane.b32.xlu1 %v1376_v57, %s1555_s25  ;;  %v1382_v15 = vpack.c.bf16 %v517_v11, %v1738_v9  ;;  %v1383_v16 = vpack.c.bf16 %v518_v14, %v518_v14 }
 0x104   : > { %430 = vrot.lane.b32.xlu0 %v1377_v3, %s1555_s25 }
 0x107   : > { %493 = vrot.lane.b32.xlu1 %v1380_v10, %s1553_s23 }
 0x108   : > { %495 = vrot.lane.b32.xlu0 %v1381_v13, %s1553_s23 }
 0x10b   : > { %530 = vrot.lane.b32.xlu1 %v1382_v15, %s1554_s24 }
 0x10c   : > { %532 = vrot.lane.b32.xlu0 %v1383_v16, %s1554_s24 }
 0x10f   : > { %630 = vrot.lane.b32.xlu1 %v1716_v55, %s1557_s9 }
 0x110   : > { %608 = vrot.lane.b32.xlu0 %v1749_v18, %s1555_s25 }
 0x113   : > { %578 = vrot.lane.b32.xlu1 %v1385_v6, %s1556_s30  ;;  %v581_v23 = vpop.permute.xlu0 %580 }
 0x114   : > { %632 = vrot.lane.b32.xlu0 %v1558_v20, %s1557_s9  ;;  %v583_v6 = vrot.slane %v581_v23, 4 }
 0x117   : > { %606 = vrot.lane.b32.xlu1 %v1387_v7, %s1555_s25 }
 0x118   : > { %659 = vrot.lane.b32.xlu0 %v1759_v21, %s1553_s23 }
 0x11b   : > { %657 = vrot.lane.b32.xlu1 %v1391_v8, %s1553_s23 }
 0x11c   : > { %782 = vperm.xlu0 %1461, %v773_v22  }
 0x11f   : > { %776 = vperm.xlu1 %1482, %v773_v22  }
 0x120   : > { %926 = vrot.lane.b32.xlu0 %v1680_v26, %s1556_s30 }
 0x171   : > { %v455_v24 = vpop.permute.xlu1 %454 }
 0x172   : > { %v457_v25 = vpop.permute.xlu0 %456  ;;  %v458_v27 = vrot.slane %v455_v24, 4 }
 0x173   : > { %v459_v28 = vrot.slane %v457_v25, 4 }
 0x175   : > { %v429_v31 = vpop.permute.xlu1 %428  ;;  %v460_v35 = vsel %vm335_vm0, %v458_v27, %v459_v28 }
 0x176   : > { %v432_v32 = vrot.slane %v429_v31, 4  ;;  %v431_v33 = vpop.permute.xlu0 %430  ;;  %v462_v26 = vsel %vm461_vm10, %v455_v24, %v460_v35 }
 0x177   : > { %v433_v34 = vrot.slane %v431_v33, 4 }
 0x179   : > { %v494_v38 = vpop.permute.xlu1 %493  ;;  %v435_v39 = vsel %vm335_vm0, %v432_v32, %v433_v34 }
 0x17a   : > { %v496_v41 = vpop.permute.xlu0 %495  ;;  %v437_v42 = vsel %vm436_vm7, %v429_v31, %v435_v39  ;;  %v497_v43 = vrot.slane %v494_v38, 4 }
 0x17b   : > { %v498_v45 = vrot.slane %v496_v41, 4  ;;  %v1326_v48 = vcombine.high %v437_v42, %v462_v26  ;;  %v1325_v49 = vcombine.low %v437_v42, %v462_v26  ;;  %v667_v26 = vld [vmem:[%s1918_s3] sm:$0xf] }
 0x17d   : > { %v531_v51 = vpop.permute.xlu1 %530  ;;  %732 = vmatprep.subr.bf16.mxu1 %v1326_v48  ;;  %v499_v57 = vsel %vm335_vm0, %v497_v43, %v498_v45 }
 0x17e   : > { %v534_v52 = vrot.slane %v531_v51, 4  ;;  %733 = vmatpush1.bf16.msra.mxu1 %v1325_v49  ;;  %v533_v53 = vpop.permute.xlu0 %532  ;;  %v501_v62 = vsel %vm409_vm6, %v494_v38, %v499_v57 }
 0x17f   : > { %v535_v58 = vrot.slane %v533_v53, 4 }
 0x181   : > { %v536_v59 = vsel %vm335_vm0, %v534_v52, %v535_v58  ;;  %v631_v60 = vpop.permute.xlu1 %630 }
 0x182   : > { %v609_v61 = vpop.permute.xlu0 %608  ;;  %v538_v63 = vsel %vm537_vm8, %v531_v51, %v536_v59  ;;  %v634_v11 = vrot.slane %v631_v60, 4 }
 0x183   : > { %v1328_v3 = vcombine.high %v501_v62, %v538_v63  ;;  %v1327_v4 = vcombine.low %v501_v62, %v538_v63  ;;  %v611_v14 = vrot.slane %v609_v61, 4 }
 0x185   : > { %v579_v5 = vpop.permute.xlu1 %578  ;;  %734 = vmatprep.subr.bf16.mxu1 %v1328_v3 }
 0x186   : > { %v582_v7 = vrot.slane %v579_v5, 4  ;;  %735 = vmatpush1.bf16.msra.mxu1 %v1327_v4  ;;  %v633_v8 = vpop.permute.xlu0 %632 }
 0x187   : > { %v635_v10 = vrot.slane %v633_v8, 4 }
 0x188   : > { %v584_v13 = vsel %vm335_vm0, %v582_v7, %v583_v6 }
 0x189   : > { %v586_v15 = vsel %vm511_vm9, %v579_v5, %v584_v13  ;;  %v607_v16 = vpop.permute.xlu1 %606  ;;  %v636_v22 = vsel %vm335_vm0, %v634_v11, %v635_v10 }
 0x18a   : > { %v1329_v17 = vcombine.low %v1716_v55, %v586_v15  ;;  %v1330_v19 = vcombine.high %v1716_v55, %v586_v15  ;;  %v610_v24 = vrot.slane %v607_v16, 4  ;;  %v660_v25 = vpop.permute.xlu0 %659  ;;  %v637_v28 = vsel %vm461_vm10, %v631_v60, %v636_v22 }
 0x18b   : > { %v662_v34 = vrot.slane %v660_v25, 4 }
 0x18c   : > { %v612_v23 = vsel %vm335_vm0, %v610_v24, %v611_v14  ;;  %736 = vmatprep.subr.bf16.mxu1 %v1330_v19 }
 0x18d   : > { %v613_v27 = vsel %vm436_vm7, %v607_v16, %v612_v23  ;;  %v658_v31 = vpop.permute.xlu1 %657  ;;  %737 = vmatpush1.bf16.msra.mxu1 %v1329_v17 }
 0x18e   : > { %v1331_v32 = vcombine.low %v613_v27, %v637_v28  ;;  %v1332_v33 = vcombine.high %v613_v27, %v637_v28  ;;  %v661_v35 = vrot.slane %v658_v31, 4 }
 0x190   : > { %v663_v38 = vsel %vm335_vm0, %v661_v35, %v662_v34  ;;  %738 = vmatprep.subr.bf16.mxu1 %v1332_v33 }
 0x191   : > { %v664_v55 = vsel %vm409_vm6, %v658_v31, %v663_v38  ;;  %739 = vmatpush1.bf16.msra.mxu1 %v1331_v32 }
 0x192   : > { %v1333_v39 = vcombine.low %v664_v55, %v664_v55  ;;  %v1334_v41 = vcombine.high %v664_v55, %v664_v55 }
 0x194   : > { %1335 = vmatprep.subr.msk.bf16.mxu1 %vm335_vm0, %v1334_v41  ;;  %v727_v42 = vsel %vm335_vm0, %v1333_v39, 0 }
 0x195   : > { %741 = vmatpush1.bf16.msra.mxu1 %v727_v42 }
 0x198   : > { %1336 = vmatmul.mubr.msk.bf16.vlgmr.msra.gmra.mrb[0].mxu1 %vm722_vm11, %v667_v26 }
 0x199   : > { %1187 = vmatprep.mubr.bf16.mxu1 %v1550_v2 }
 0x19b   : > { %v783_v51 = vpop.permute.xlu0 %782 }
 0x19e   : > { %v777_v43 = vpop.permute.xlu1 %776 }
 0x26b   : > { %v766_v45 = vpop.f32.mrb[0].mxu1 }
 0x26c   : > { %v779_v48 = vmul.f32 %v777_v43, %v766_v45  ;;  %v768_v49 = vpop.f32.mrb[1].mxu1 }
 0x26d   : > { %v780_v52 = vmul.f32 %v777_v43, %v768_v49  ;;  %v770_v53 = vpop.f32.mrb[2].mxu1 }
 0x26e   : > { %v785_v57 = vadd.f32 %v783_v51, %v779_v48  ;;  %v771_v58 = vpop.f32.mrb[3].mxu1 }
 0x26f   : > { %v786_v59 = vadd.f32 %v783_v51, %v780_v52 }
 0x270   : > { %v787_v60 = vmax.f32 %v785_v57, 0.0 }
 0x271   : > { %v788_v61 = vmax.f32 %v786_v59, 0.0 }
 0x272   : > { %v1395_v62 = vpack.c.bf16 %v787_v60, %v1552_v12  ;;  %v795_v63 = vmul.f32 %v787_v60, %v1695_v40  ;;  %v846_v7 = vmul.f32 %v787_v60, %v1705_v47  ;;  %v910_v8 = vmul.f32 %v1697_v44, %v787_v60 }
 0x273   : > { %v1396_v3 = vpack.c.bf16 %v788_v61, %v788_v61  ;;  %v796_v4 = vmul.f32 %v1684_v29, %v788_v61  ;;  %v1799_v5 = vpack.c.bf16 %v788_v61, %v787_v60  ;;  %v911_v10 = vmul.f32 %v788_v61, %v1720_v56 }
 0x274   : > { %832 = vrot.lane.b32.xlu1 %v1395_v62, %s1557_s9  ;;  %v1393_v6 = vpack.c.bf16 %v795_v63, %v1700_v46  ;;  %v937_v12 = vmul.f32 %v1686_v30, %v787_v60  ;;  %v938_v11 = vmul.f32 %v788_v61, %v1695_v40  ;;  %v988_v29 = vmul.f32 %v1690_v37, %v787_v60 }
 0x275   : > { %834 = vrot.lane.b32.xlu0 %v1396_v3, %s1557_s9  ;;  %v1394_v13 = vpack.c.bf16 %v796_v4, %v796_v4  ;;  %v847_v14 = vmul.f32 %v1688_v36, %v788_v61  ;;  %v989_v15 = vmul.f32 %v788_v61, %v1705_v47  ;;  %v1402_v46 = vpack.c.bf16 %v911_v10, %v910_v8  ;;  %v1367_v47 = vld [vmem:[%s1919_s4 + $0x8] sm:$0xff] }
 0x276   : > { %v1404_v16 = vpack.c.bf16 %v938_v11, %v937_v12  ;;  %v1397_v56 = vpack.c.bf16 %v846_v7, %v1714_v54  ;;  %v873_v30 = vmul.f32 %v787_v60, %v1732_v0  ;;  %v874_v40 = vmul.f32 %v1709_v50, %v788_v61  ;;  %v324_v50 = vld [vmem:[#allocation4] sm:$0x1]  ;;  %v927_v54 = vpop.permute.xlu0 %926 }
 0x277   : > { %v1408_v44 = vpack.c.bf16 %v989_v15, %v988_v29  ;;  %v1398_v17 = vpack.c.bf16 %v847_v14, %v847_v14  ;;  %v929_v57 = vrot.slane %v927_v54, 4 }
 0x278   : > { %808 = vrot.lane.b32.xlu1 %v1393_v6, %s1555_s25  ;;  %v1399_v36 = vpack.c.bf16 %v873_v30, %v1738_v9  ;;  %v1400_v37 = vpack.c.bf16 %v874_v40, %v874_v40 }
 0x279   : > { %810 = vrot.lane.b32.xlu0 %v1394_v13, %s1555_s25 }
 0x27c   : > { %859 = vrot.lane.b32.xlu1 %v1397_v56, %s1553_s23 }
 0x27d   : > { %861 = vrot.lane.b32.xlu0 %v1398_v17, %s1553_s23 }
 0x280   : > { %886 = vrot.lane.b32.xlu1 %v1399_v36, %s1554_s24  ;;  %v1354_v36 = vld [vmem:[%s1918_s3 + $0x4] sm:$0xf] }
 0x281   : > { %888 = vrot.lane.b32.xlu0 %v1400_v37, %s1554_s24 }
 0x284   : > { %975 = vrot.lane.b32.xlu1 %v1799_v5, %s1557_s9 }
 0x285   : > { %953 = vrot.lane.b32.xlu0 %v1749_v18, %s1555_s25 }
 0x288   : > { %924 = vrot.lane.b32.xlu1 %v1402_v46, %s1556_s30 }
 0x289   : > { %977 = vrot.lane.b32.xlu0 %v1558_v20, %s1557_s9 }
 0x28c   : > { %951 = vrot.lane.b32.xlu1 %v1404_v16, %s1555_s25  ;;  %s1410_s25 = sshll.u32 %s1625_s6, 5  ;;  %s1560_s6 = smov [#allocation5]  }
 0x28d   : > { %1004 = vrot.lane.b32.xlu0 %v1759_v21, %s1553_s23  ;;  %s1873_s15 = scalar_lea.hbm %s1922_s7, %s1410_s25  ;;  %s1490_s18 = sshll.u32 %s1560_s6, 4  ;;  %s1491_s18 = int_to_ptr.vmem [resolvable:$false] %s1490_s18 }
 0x28e   : > { %s1492_s19 = scalar_lea.vmem %s1491_s18, 64 }
 0x290   : > { %1002 = vrot.lane.b32.xlu1 %v1408_v44, %s1553_s23  ;;  %s271_s23 = sand.u32 1, %s1540_s27  }
 0x291   : > { %1128 = vperm.xlu0 %1461, %v1367_v47   ;;  %s1297_s24 = sshll.u32 %s271_s23, 1  ;;  %s1220_s16 = scalar_lea.sflag [#allocation6], %s271_s23 }
 0x292   : > { %s273_s30 = scalar_lea.vmem [#allocation5], %s1297_s24 }
 0x293   : > { %s1234_s9 = sshll.u32 %s273_s30, 4  ;;  %s1875_s9 = int_to_ptr.vmem [resolvable:$true] %s1234_s9 }
 0x294   : > { %1122 = vperm.xlu1 %1482, %v1367_v47   ;;  %s1486_s17 = scalar_lea.vmem %s1875_s9, 32  ;;  %p1493_p0 = scmp.lt.s32.totalorder %s1875_s9, %s1491_s18 }
 0x295   : > { %1483 = vset.pattern.permute.xlu0 %v1550_v2  ;;  %p1487_p11 = scmp.ne.s32.totalorder %s1875_s9, %s1486_s17  ;;  %p1494_p1 = scmp.lt.s32.totalorder %s1492_s19, %s1486_s17 }
 0x297   : > { %p1488_p12 = pnand %p1487_p11, %p1642_p5  ;;  %p1495_p2 = por %p1494_p1, %p1493_p0 }
 0x298   : > { %1139 = vperm.xlu1 %1482, %v324_v50  }
 0x299   : > { %p1489_p13 = pneg %p1488_p12 }
 0x29b   : > { %p1496_p3 = pnand %p1495_p2, %p1489_p13 }
 0x2e6   : > { %v833_v0 = vpop.permute.xlu1 %832 }
 0x2e7   : > { %v835_v9 = vpop.permute.xlu0 %834  ;;  %v836_v18 = vrot.slane %v833_v0, 4 }
 0x2e8   : > { %v837_v20 = vrot.slane %v835_v9, 4 }
 0x2ea   : > { %v809_v19 = vpop.permute.xlu1 %808  ;;  %v838_v24 = vsel %vm335_vm0, %v836_v18, %v837_v20 }
 0x2eb   : > { %v812_v22 = vrot.slane %v809_v19, 4  ;;  %v811_v21 = vpop.permute.xlu0 %810  ;;  %v839_v2 = vsel %vm461_vm10, %v833_v0, %v838_v24 }
 0x2ec   : > { %v813_v25 = vrot.slane %v811_v21, 4 }
 0x2ee   : > { %v814_v23 = vsel %vm335_vm0, %v812_v22, %v813_v25  ;;  %v860_v27 = vpop.permute.xlu1 %859 }
 0x2ef   : > { %v862_v28 = vpop.permute.xlu0 %861  ;;  %v815_v31 = vsel %vm436_vm7, %v809_v19, %v814_v23  ;;  %v863_v32 = vrot.slane %v860_v27, 4 }
 0x2f0   : > { %v864_v33 = vrot.slane %v862_v28, 4  ;;  %v1355_v34 = vcombine.low %v815_v31, %v839_v2  ;;  %v1356_v35 = vcombine.high %v815_v31, %v839_v2  ;;  %v323_v28 = vld [vmem:[%s1920_s5] sm:$0x1]  ;;  %v1143_v31 = vshrl.u32 %v280_v1, 7 }
 0x2f1   : > { %v1559_v2 = vmov 1966171168  }
 0x2f2   : > { %v887_v38 = vpop.permute.xlu1 %886  ;;  %1077 = vmatprep.subr.bf16.mxu0 %v1356_v35  ;;  %v865_v41 = vsel %vm335_vm0, %v863_v32, %v864_v33  ;;  %v1200_v32 = vunpack.c.l.s4 %v1559_v2  ;;  %v1144_v33 = vsub.s32 0, %v1143_v31 }
 0x2f3   : > { %v890_v55 = vrot.slane %v887_v38, 4  ;;  %1078 = vmatpush1.bf16.msra.mxu0 %v1355_v34  ;;  %v889_v39 = vpop.permute.xlu0 %888  ;;  %v866_v48 = vsel %vm409_vm6, %v860_v27, %v865_v41 }
 0x2f4   : > { %v891_v42 = vrot.slane %v889_v39, 4  ;;  %v1201_v35 = vunpack.c.0.s8 %v1200_v32 }
 0x2f6   : > { %v892_v26 = vsel %vm335_vm0, %v890_v55, %v891_v42  ;;  %v976_v43 = vpop.permute.xlu1 %975 }
 0x2f7   : > { %v954_v45 = vpop.permute.xlu0 %953  ;;  %v893_v49 = vsel %vm537_vm8, %v887_v38, %v892_v26  ;;  %v979_v61 = vrot.slane %v976_v43, 4  ;;  %v1204_v26 = vsub.s32 %v1201_v35, %v1143_v31 }
 0x2f8   : > { %v1357_v51 = vcombine.low %v866_v48, %v893_v49  ;;  %v1358_v52 = vcombine.high %v866_v48, %v893_v49  ;;  %v956_v63 = vrot.slane %v954_v45, 4 }
 0x2fa   : > { %v925_v53 = vpop.permute.xlu1 %924  ;;  %1079 = vmatprep.subr.bf16.mxu0 %v1358_v52 }
 0x2fb   : > { %v928_v58 = vrot.slane %v925_v53, 4  ;;  %1080 = vmatpush1.bf16.msra.mxu0 %v1357_v51  ;;  %v978_v59 = vpop.permute.xlu0 %977 }
 0x2fc   : > { %v980_v60 = vrot.slane %v978_v59, 4 }
 0x2fd   : > { %v930_v62 = vsel %vm335_vm0, %v928_v58, %v929_v57 }
 0x2fe   : > { %v931_v3 = vsel %vm511_vm9, %v925_v53, %v930_v62  ;;  %v952_v4 = vpop.permute.xlu1 %951  ;;  %v981_v8 = vsel %vm335_vm0, %v979_v61, %v980_v60 }
 0x2ff   : > { %v1359_v6 = vcombine.low %v1799_v5, %v931_v3  ;;  %v1360_v7 = vcombine.high %v1799_v5, %v931_v3  ;;  %v955_v10 = vrot.slane %v952_v4, 4  ;;  %v1005_v12 = vpop.permute.xlu0 %1004  ;;  %v982_v13 = vsel %vm461_vm10, %v976_v43, %v981_v8 }
 0x300   : > { %v1007_v16 = vrot.slane %v1005_v12, 4 }
 0x301   : > { %v957_v11 = vsel %vm335_vm0, %v955_v10, %v956_v63  ;;  %1081 = vmatprep.subr.bf16.mxu0 %v1360_v7 }
 0x302   : > { %v958_v29 = vsel %vm436_vm7, %v952_v4, %v957_v11  ;;  %v1003_v14 = vpop.permute.xlu1 %1002  ;;  %1082 = vmatpush1.bf16.msra.mxu0 %v1359_v6 }
 0x303   : > { %v1361_v15 = vcombine.low %v958_v29, %v982_v13  ;;  %v1362_v46 = vcombine.high %v958_v29, %v982_v13  ;;  %v1006_v44 = vrot.slane %v1003_v14, 4 }
 0x305   : > { %v1008_v56 = vsel %vm335_vm0, %v1006_v44, %v1007_v16  ;;  %1083 = vmatprep.subr.bf16.mxu0 %v1362_v46 }
 0x306   : > { %v1009_v5 = vsel %vm409_vm6, %v1003_v14, %v1008_v56  ;;  %1084 = vmatpush1.bf16.msra.mxu0 %v1361_v15 }
 0x307   : > { %v1363_v30 = vcombine.low %v1009_v5, %v1009_v5  ;;  %v1364_v17 = vcombine.high %v1009_v5, %v1009_v5 }
 0x309   : > { %1365 = vmatprep.subr.msk.bf16.mxu0 %vm335_vm0, %v1364_v17  ;;  %v1072_v40 = vsel %vm335_vm0, %v1363_v30, 0 }
 0x30a   : > { %1086 = vmatpush1.bf16.msra.mxu0 %v1072_v40 }
 0x30d   : > { %1366 = vmatmul.mubr.msk.bf16.vlgmr.msra.gmra.mrb[4].mxu0 %vm722_vm11, %v1354_v36 }
 0x310   : > { %v1129_v0 = vpop.permute.xlu0 %1128 }
 0x313   : > { %v1123_v37 = vpop.permute.xlu1 %1122 }
 0x317   : > { %v1140_v34 = vpop.permute.xlu1 %1139 }
 0x318   : > { %v1145_v38 = vrot.slane %v1140_v34, %v1144_v33 }
 0x3e0   : > { %v1111_v47 = vpop.f32.mrb[4].mxu0 }
 0x3e1   : > { %v1125_v50 = vmul.f32 %v1123_v37, %v1111_v47  ;;  %v1113_v54 = vpop.f32.mrb[5].mxu0 }
 0x3e2   : > { %v1126_v9 = vmul.f32 %v1123_v37, %v1113_v54  ;;  %v1115_v18 = vpop.f32.mrb[6].mxu0 }
 0x3e3   : > { %v1131_v20 = vadd.f32 %v1129_v0, %v1125_v50  ;;  %v1116_v19 = vpop.f32.mrb[7].mxu0 }
 0x3e4   : > { %v1132_v22 = vadd.f32 %v1129_v0, %v1126_v9 }
 0x3e5   : > { %v1133_v21 = vmax.f32 %v1131_v20, 0.0 }
 0x3e6   : > { %v1134_v24 = vmax.f32 %v1132_v22, 0.0 }
 0x3e7   : > { %v1135_v25 = vpack.c.bf16 %v1133_v21, %v1133_v21 }
 0x3e8   : > { %v1136_v23 = vpack.c.bf16 %v1134_v24, %v1134_v24 }
 0x3e9   : > { %v1150_v27 = vsel %vm335_vm0, %v1135_v25, 0 }
 0x3ea   : > { %1368 = vmatprep.subr.msk.bf16.mxu1 %vm335_vm0, %v1136_v23 }
 0x3eb   : > { %1156 = vmatpush1.bf16.msra.mxu1 %v1150_v27 }
 0x3ee   : > { %1369 = vmatmul.mubr.msk.bf16.vlgmr.msra.gmra.mrb[4].mxu1 %vm331_vm5, %v323_v28 }
 0x4c1   : > { %v1189_v55 = vpop.f32.mrb[4].mxu1 }
 0x4c2   : > { %v1190_v39 = vadd.f32 %v1189_v55, %v1145_v38  ;;  %v1191_v41 = vpop.f32.mrb[5].mxu1 }
 0x4c3   : > { %v1192_v42 = vadd.f32 %v1191_v41, %v1145_v38  ;;  %v1193_v43 = vpop.f32.mrb[6].mxu1 }
 0x4c4   : > { %v1194_v45 = vpop.f32.mrb[7].mxu1 }
 0x4c5   : > { %v1198_v48 = vcombine.low %v1190_v39, %v1192_v42 }
 0x4c7   : > { %v1205_v49 = vrot.slane %v1198_v48, %v1204_v26 }
 0x4c9   : > { %v1212_v51 = vrot.slane %v1205_v49, %v1204_v26 }
 0x4cb   : > { %1218 = vst.msk [vmem:[%s273_s30] sm:$0x3] %vm1216_vm12, %v1212_v51 }
 0x4cc   : > { %1499 = shalt.err (!%p1496_p3)
}
 0x4cd   : > { %s1500_s20 = scalar_lea.hbm %s1873_s15, 32  ;;  %s1504_s23 = scalar_lea.hbm %s1922_s7, 64 }
 0x4ce   : > { %p1501_p4 = scmp.ne.s32.totalorder %s1873_s15, %s1500_s20  ;;  %p1505_p9 = scmp.lt.u32.totalorder %s1873_s15, %s1922_s7 }
 0x4cf   : > { %p1506_p10 = scmp.lt.u32.totalorder %s1504_s23, %s1500_s20  ;;  %p1508_p12 = scmp.lt.u32.totalorder %s1500_s20, %s1873_s15 }
 0x4d0   : > { %p1502_p7 = pnand %p1501_p4, %p1642_p5 }
 0x4d1   : > { %p1507_p11 = por %p1506_p10, %p1505_p9 }
 0x4d2   : > { %p1503_p8 = pneg %p1502_p7 }
 0x4d3   : > { %p1509_p13 = por %p1508_p12, %p1507_p11 }
 0x4d5   : > { %p1510_p0 = pnand %p1509_p13, %p1503_p8 }
 0x4d7   : > { %1513 = shalt.err (!%p1510_p0)
}
 0x4d8   : > { %1411 = dma.vmem_to_hbm [thread:$0]  (%p1642_p5), %s1875_s9, 32, %s1873_s15, %s1220_s16  }
 0x4d9 PF: > { %p1417_p1 = scmp.ge.s32.totalorder %s1548_s29, 2  ;;  %s1246_s30 = sand.u32 1, %s1536_s26  }
 0x4da   : > { %s1247_s10 = scalar_lea.sflag [#allocation6], %s1246_s30 }
 0x4db   : > { %p1414_p2 = pnand %p1417_p1, %p1646_p6 }
 0x4dd   : > { %1531 = dma.done.wait (!%p1414_p2), %s1247_s10, 32  }
 0x4de   : > { %1533 = vsyncadd (!%p1414_p2), %s1247_s10, 4294967264  ;;  %p19_p3 = scmp.ge.s32.totalorder %s1629_s8, 4   ;;  %s1925_s26 = smov %s1540_s27 }
 0x4df   : > { %s1926_s27 = smov %s1544_s28  ;;  %s1927_s28 = smov %s1640_s11 }
 0x4e0   : > { %s1928_s29 = smov %s1629_s8  ;;  %21 = sbr.rel (!%p19_p3) target bundleno = 6 (0x6), region = 85 }
 0x4e7   :  { %1252 = vsyncpa [#allocation6], 1 }
 0x4e8   :  { %1254 = vsyncpa [#allocation6 + $0x1], 1 }

</bundles_post_ra>
